<compile_context>
chip_gen: v7x
topology: tpu7x:2x2x1
jax: 0.10.0
libtpu: 0.0.40
codegen_flags: <defaults>
</compile_context>

<pallas_src>
import functools
import math

import jax
import jax.numpy as jnp
from jax import lax
from jax.experimental import pallas as pl
from jax.experimental.pallas import tpu as pltpu

N_HEADS = 4          # GAT(n_heads=4) inside VerticalGAT.__init__
LEAKY_ALPHA = 0.1    # GAT default alpha
DROPOUT_P = 0.2      # noted only; dropout is identity here (eval mode)


# -----------------------------------------------------------------------------
# Fused per-batch kernel: conv q/k/v -> adj -> 4-head GAT (lane-stacked) ->
# out head -> elu -> log_softmax -> final Linear.
# -----------------------------------------------------------------------------
def _vertical_gat_kernel(
    xpad_ref, wt_ref, bqkv_ref,
    wl_ref, bl_ref, ai_mask_ref, aib_ref, aj_bd_ref, ajb_ref, rmat_ref,
    wo_ref, bo_ref, aoi_ref, aoib_ref, aoj_ref, aojb_ref,
    wpt_ref, bp_ref,
    x_out_ref, adjt_out_ref,
    *, win, feat, nh, heads, alpha):
  f32 = jnp.float32
  scale = 1.0 / math.sqrt(feat)

  def mm(a, b):
    return jnp.dot(a, b, preferred_element_type=f32)

  def mm_c0(a, b):
    # (K, M) x (K, N) -> (M, N): contract dim 0 of both operands.
    return lax.dot_general(a, b, (((0,), (0,)), ((), ())),
                           preferred_element_type=f32)

  def leaky_relu(z):
    return jnp.maximum(z, alpha * z)          # alpha in (0, 1)

  def elu(z):
    return jnp.where(z > 0.0, z, jnp.exp(jnp.minimum(z, 0.0)) - 1.0)

  def masked_softmax_ax0(e, mask):
    z = jnp.where(mask, e, -1e9)              # module uses -1e9 exactly
    z = z - jnp.max(z, axis=0, keepdims=True)
    p = jnp.exp(z)
    return p * pl.reciprocal(jnp.sum(p, axis=0, keepdims=True), approx=True)

  # ---- q/k/v Conv1d(k=3, pad=1), transposed (W, F) layout --------------------
  xp = xpad_ref[0, 0:win, :]                  # x[t-1] (zero padded)
  xc = xpad_ref[0, 1:win + 1, :]              # x[t]
  xn = xpad_ref[0, 2:win + 2, :]              # x[t+1] (zero padded)
  qkv_t = (mm(xp, wt_ref[0]) + mm(xc, wt_ref[1]) + mm(xn, wt_ref[2])
           + bqkv_ref[...])                   # (W, 3F) = [q^T | k^T | v^T]
  qt = qkv_t[:, 0:feat]                       # (W, F)
  kt = qkv_t[:, feat:2 * feat]                # (W, F)
  vt = qkv_t[:, 2 * feat:3 * feat]            # (W, F)

  # ---- adj = sigmoid(scale * q k^T), computed (and stored) transposed --------
  logits_t = scale * mm_c0(kt, qt)            # (F, F) == (q k^T)^T
  adj_t = pl.reciprocal(1.0 + jnp.exp(-logits_t), approx=True)
  adjt_out_ref[0] = adj_t                     # wrapper flips back to adj
  mask_t = adj_t > 0.0                        # == (adj > 0)^T

  # ---- 4-head GAT, heads stacked along the lane axis -------------------------
  wh_t = mm(wl_ref[...], vt) + bl_ref[...]    # (heads*nh, F) == stacked Wh^T
  wh_tiled = jnp.tile(wh_t, (1, heads))       # (heads*nh, heads*F)
  wh1_row = (jnp.sum(wh_tiled * ai_mask_ref[...], axis=0, keepdims=True)
             + aib_ref[...])                  # (1, heads*F): aiLinear(Wh) per head
  wh2_cols = mm_c0(wh_t, aj_bd_ref[...]) + ajb_ref[...]   # (F, heads)
  e_all = leaky_relu(mm(wh2_cols, rmat_ref[...]) + wh1_row)  # (F, heads*F)
  mask_all = jnp.tile(adj_t, (1, heads)) > 0.0
  att_all = masked_softmax_ax0(e_all, mask_all)            # (F, heads*F)
  # TODO(synk): F.dropout(attention, 0.2, training=self.training) is identity
  # here (inference / eval mode).

  big = elu(mm(wh_t, att_all))                # (heads*nh, heads*F); per-head
                                              # diagonal blocks = elu(att @ Wh)^T
  who_t = mm(wo_ref[0], big[0:nh, 0:feat]) + bo_ref[...]   # init with head 0
  for h in range(1, heads):
    who_t = who_t + mm(wo_ref[h],
                       big[h * nh:(h + 1) * nh, h * feat:(h + 1) * feat])
  # who_t: (W, F) == (cat @ Wo^T + bo)^T
  # TODO(synk): F.dropout on the concatenated head outputs treated as identity.

  # ---- output attention layer (concat=False) + ELU + log_softmax(dim=2) ------
  wh1o = mm(aoi_ref[...], who_t) + aoib_ref[...]           # (1, F)
  wh2o = mm_c0(who_t, aoj_ref[...]) + aojb_ref[...]        # (F, 1)
  e_o = leaky_relu(wh2o + wh1o)                            # (F, F), transposed
  att_o = masked_softmax_ax0(e_o, mask_t)
  gat_t = elu(mm(who_t, att_o))                            # (W, F)
  gat_t = gat_t - jnp.max(gat_t, axis=0, keepdims=True)
  gat_t = gat_t - jnp.log(jnp.sum(jnp.exp(gat_t), axis=0, keepdims=True))

  # ---- final Linear(d_model, d_model) on x.transpose(2, 1) --------------------
  x_out_ref[0] = mm(gat_t, wpt_ref[...]) + bp_ref[...]     # (W, F)


# -----------------------------------------------------------------------------
# Wrapper: pack / pre-transpose all parameters on the host side, grid over batch.
# -----------------------------------------------------------------------------
@jax.jit
def vertical_gat_forward(x, params):
  b, w, f = x.shape
  heads = N_HEADS
  nh = w // 2
  hf = heads * f
  f32 = jnp.float32
  x = x.astype(f32)

  # conv padding done once here (replaces the O((B*W)^2) shift matrices).
  xpad = jnp.pad(x, ((0, 0), (1, 1), (0, 0)))               # (B, W+2, F)

  wq, bq = params["wq"], params["bq"]
  wk, bk = params["wk"], params["bk"]
  wv, bv = params["wv"], params["bv"]
  wt = jnp.stack([jnp.concatenate(
      [wq[:, :, k].T, wk[:, :, k].T, wv[:, :, k].T], axis=1) for k in range(3)])
  bqkv = jnp.concatenate([bq, bk, bv]).reshape(1, 3 * f)

  hp = params["heads"]
  wl = jnp.concatenate([h["w"] for h in hp], axis=0)        # (heads*nh, W)
  bl = jnp.concatenate([h["wb"] for h in hp]).reshape(heads * nh, 1)

  # block matrices for the lane-stacked head math
  ai_mask = jnp.zeros((heads * nh, hf), f32)                # ai_h broadcast per block
  aj_bd = jnp.zeros((heads * nh, heads), f32)               # block-diagonal aj
  for i, h in enumerate(hp):
    ai_mask = ai_mask.at[i * nh:(i + 1) * nh, i * f:(i + 1) * f].set(
        jnp.broadcast_to(h["ai"].reshape(nh, 1), (nh, f)))
    aj_bd = aj_bd.at[i * nh:(i + 1) * nh, i].set(h["aj"].reshape(nh))
  aib = jnp.repeat(jnp.stack([h["aib"][0] for h in hp]), f).reshape(1, hf)
  ajb = jnp.stack([h["ajb"][0] for h in hp]).reshape(1, heads)
  rmat = jnp.kron(jnp.eye(heads, dtype=f32), jnp.ones((1, f), f32))  # (heads, heads*F)

  op = params["out"]
  wo = jnp.stack([op["w"][:, i * nh:(i + 1) * nh] for i in range(heads)])  # (heads, W, nh)
  bo = op["wb"].reshape(w, 1)
  aoi = op["ai"]                                            # (1, W)
  aoib = op["aib"].reshape(1, 1)
  aoj = op["aj"].reshape(w, 1)
  aojb = op["ajb"].reshape(1, 1)

  wpt = params["proj_w"].T                                  # (F, F)
  bp = params["proj_b"].reshape(1, f)

  operands = (xpad, wt, bqkv, wl, bl, ai_mask, aib, aj_bd, ajb, rmat,
              wo, bo, aoi, aoib, aoj, aojb, wpt, bp)

  def batch_spec(*tail):
    return pl.BlockSpec((1,) + tuple(tail),
                        lambda i, n=len(tail): (i,) + (0,) * n)

  def const_spec(a):
    return pl.BlockSpec(a.shape, lambda i, n=a.ndim: (0,) * n)

  in_specs = [batch_spec(w + 2, f)] + [const_spec(a) for a in operands[1:]]

  kernel = functools.partial(
      _vertical_gat_kernel,
      win=w, feat=f, nh=nh, heads=heads, alpha=LEAKY_ALPHA)

  flops_per_b = 2 * (3 * w * f * 3 * f + f * f * w + heads * nh * w * f
                     + heads * nh * hf + f * heads * nh * heads + f * heads * hf
                     + heads * nh * f * hf + heads * w * nh * f
                     + 2 * w * f + 2 * w * f * f)
  trans_per_b = f * f + f * hf + heads * nh * hf + 2 * f * f + 2 * w * f
  bytes_accessed = 4 * (sum(a.size for a in operands) + b * w * f + b * f * f)

  x_out, adj_t = pl.pallas_call(
      kernel,
      grid_spec=pltpu.PrefetchScalarGridSpec(
          num_scalar_prefetch=0,
          grid=(b,),
          in_specs=in_specs,
          out_specs=(batch_spec(w, f), batch_spec(f, f)),
      ),
      out_shape=(
          jax.ShapeDtypeStruct((b, w, f), f32),     # projected output
          jax.ShapeDtypeStruct((b, f, f), f32),     # adj^T (flipped below)
      ),
      compiler_params=pltpu.CompilerParams(
          dimension_semantics=("parallel",),
          vmem_limit_bytes=16 * 1024 * 1024),
      cost_estimate=pl.CostEstimate(
          flops=int(b * flops_per_b),
          transcendentals=int(b * trans_per_b),
          bytes_accessed=int(bytes_accessed)),
  )(*operands)

  # adj was produced transposed in-kernel; flip back here (layout plumbing only).
  return x_out, jnp.transpose(adj_t, (0, 2, 1))


# -----------------------------------------------------------------------------
# Deterministic parameter construction mirroring the PyTorch module's shapes.
# -----------------------------------------------------------------------------
def init_params(key, d_model, input_window, n_heads=N_HEADS):
  f, w = d_model, input_window
  nh = w // 2
  kit = iter(jax.random.split(key, 64))

  def uni(shape, bound):
    return jax.random.uniform(next(kit), shape, jnp.float32, -bound, bound)

  def conv1d():
    bound = 1.0 / math.sqrt(f * 3)
    return uni((f, f, 3), bound), uni((f,), bound)

  def gat_layer(in_f, out_f):
    gw = 1.414 * math.sqrt(6.0 / (in_f + out_f))     # xavier_uniform, gain 1.414
    ga = 1.414 * math.sqrt(6.0 / (out_f + 1))
    return {"w": uni((out_f, in_f), gw), "wb": uni((out_f,), 1.0 / math.sqrt(in_f)),
            "ai": uni((1, out_f), ga), "aib": uni((1,), 1.0 / math.sqrt(out_f)),
            "aj": uni((1, out_f), ga), "ajb": uni((1,), 1.0 / math.sqrt(out_f))}

  wq, bq = conv1d()
  wk, bk = conv1d()
  wv, bv = conv1d()
  pb = 1.0 / math.sqrt(f)
  return {
      "wq": wq, "bq": bq, "wk": wk, "bk": bk, "wv": wv, "bv": bv,
      "heads": [gat_layer(w, nh) for _ in range(n_heads)],
      "out": gat_layer(n_heads * nh, w),
      "proj_w": uni((f, f), pb), "proj_b": uni((f,), pb),
  }


if __name__ == "__main__":
  # VerticalGAT forward requires d_model == feature_size (Conv1d channel count)
  # and an even input_window (n_hid = input_window // 2).
  B, W, F_ = 2, 8, 16           # batch, input_window, d_model == feature_size

  key = jax.random.PRNGKey(0)
  kx, kp = jax.random.split(key)
  x = jax.random.normal(kx, (B, W, F_), jnp.float32)
  params = init_params(kp, d_model=F_, input_window=W)

  x_out, adj = vertical_gat_forward(x, params)
  jax.block_until_ready((x_out, adj))

  assert x_out.shape == (B, W, F_) and adj.shape == (B, F_, F_)
  assert bool(jnp.all(jnp.isfinite(x_out))) and bool(jnp.all(jnp.isfinite(adj)))
  # adj is a sigmoid output (approx reciprocal) -> must stay within [0, 1]
  assert bool(jnp.all(adj >= 0.0)) and bool(jnp.all(adj <= 1.0))
  print("KERNEL_OK")
</pallas_src>

<mosaic_0001>
module attributes {stable_mosaic.version = 11 : i64} {
  func.func @_vertical_gat_kernel(%arg0: i32, %arg1: memref<1x10x16xf32, #tpu.memory_space<vmem>>, %arg2: memref<3x16x48xf32, #tpu.memory_space<vmem>>, %arg3: memref<1x48xf32, #tpu.memory_space<vmem>>, %arg4: memref<16x8xf32, #tpu.memory_space<vmem>>, %arg5: memref<16x1xf32, #tpu.memory_space<vmem>>, %arg6: memref<16x64xf32, #tpu.memory_space<vmem>>, %arg7: memref<1x64xf32, #tpu.memory_space<vmem>>, %arg8: memref<16x4xf32, #tpu.memory_space<vmem>>, %arg9: memref<1x4xf32, #tpu.memory_space<vmem>>, %arg10: memref<4x64xf32, #tpu.memory_space<vmem>>, %arg11: memref<4x8x4xf32, #tpu.memory_space<vmem>>, %arg12: memref<8x1xf32, #tpu.memory_space<vmem>>, %arg13: memref<1x8xf32, #tpu.memory_space<vmem>>, %arg14: memref<1x1xf32, #tpu.memory_space<vmem>>, %arg15: memref<8x1xf32, #tpu.memory_space<vmem>>, %arg16: memref<1x1xf32, #tpu.memory_space<vmem>>, %arg17: memref<16x16xf32, #tpu.memory_space<vmem>>, %arg18: memref<1x16xf32, #tpu.memory_space<vmem>>, %arg19: memref<1x8x16xf32, #tpu.memory_space<vmem>>, %arg20: memref<1x16x16xf32, #tpu.memory_space<vmem>>) attributes {dimension_semantics = [#tpu.dimension_semantics<parallel>], iteration_bounds = array<i64: 2>, scalar_prefetch = 0 : i64, scratch_operands = 0 : i64, tpu.core_type = #tpu.core_type<tc>, window_params = [{transform_indices = @transform_0, window_bounds = array<i64: 1, 10, 16>}, {pipeline_mode = #tpu.pipeline_mode<synchronous>, transform_indices = @transform_1, window_bounds = array<i64: 3, 16, 48>}, {pipeline_mode = #tpu.pipeline_mode<synchronous>, transform_indices = @transform_2, window_bounds = array<i64: 1, 48>}, {pipeline_mode = #tpu.pipeline_mode<synchronous>, transform_indices = @transform_3, window_bounds = array<i64: 16, 8>}, {pipeline_mode = #tpu.pipeline_mode<synchronous>, transform_indices = @transform_4, window_bounds = array<i64: 16, 1>}, {pipeline_mode = #tpu.pipeline_mode<synchronous>, transform_indices = @transform_5, window_bounds = array<i64: 16, 64>}, {pipeline_mode = #tpu.pipeline_mode<synchronous>, transform_indices = @transform_6, window_bounds = array<i64: 1, 64>}, {pipeline_mode = #tpu.pipeline_mode<synchronous>, transform_indices = @transform_7, window_bounds = array<i64: 16, 4>}, {pipeline_mode = #tpu.pipeline_mode<synchronous>, transform_indices = @transform_8, window_bounds = array<i64: 1, 4>}, {pipeline_mode = #tpu.pipeline_mode<synchronous>, transform_indices = @transform_9, window_bounds = array<i64: 4, 64>}, {pipeline_mode = #tpu.pipeline_mode<synchronous>, transform_indices = @transform_10, window_bounds = array<i64: 4, 8, 4>}, {pipeline_mode = #tpu.pipeline_mode<synchronous>, transform_indices = @transform_11, window_bounds = array<i64: 8, 1>}, {pipeline_mode = #tpu.pipeline_mode<synchronous>, transform_indices = @transform_12, window_bounds = array<i64: 1, 8>}, {pipeline_mode = #tpu.pipeline_mode<synchronous>, transform_indices = @transform_13, window_bounds = array<i64: 1, 1>}, {pipeline_mode = #tpu.pipeline_mode<synchronous>, transform_indices = @transform_14, window_bounds = array<i64: 8, 1>}, {pipeline_mode = #tpu.pipeline_mode<synchronous>, transform_indices = @transform_15, window_bounds = array<i64: 1, 1>}, {pipeline_mode = #tpu.pipeline_mode<synchronous>, transform_indices = @transform_16, window_bounds = array<i64: 16, 16>}, {pipeline_mode = #tpu.pipeline_mode<synchronous>, transform_indices = @transform_17, window_bounds = array<i64: 1, 16>}, {transform_indices = @transform_18, window_bounds = array<i64: 1, 8, 16>}, {transform_indices = @transform_19, window_bounds = array<i64: 1, 16, 16>}]} {
    %c0 = arith.constant 0 : index
    %c0_0 = arith.constant 0 : index
    %c0_1 = arith.constant 0 : index
    %0 = vector.load %arg1[%c0, %c0_0, %c0_1] : memref<1x10x16xf32, #tpu.memory_space<vmem>>, vector<1x8x16xf32>
    %1 = vector.shape_cast %0 : vector<1x8x16xf32> to vector<8x16xf32>
    %c0_2 = arith.constant 0 : index
    %c1 = arith.constant 1 : index
    %c0_3 = arith.constant 0 : index
    %2 = vector.load %arg1[%c0_2, %c1, %c0_3] : memref<1x10x16xf32, #tpu.memory_space<vmem>>, vector<1x8x16xf32>
    %3 = vector.shape_cast %2 : vector<1x8x16xf32> to vector<8x16xf32>
    %c0_4 = arith.constant 0 : index
    %c2 = arith.constant 2 : index
    %c0_5 = arith.constant 0 : index
    %4 = vector.load %arg1[%c0_4, %c2, %c0_5] : memref<1x10x16xf32, #tpu.memory_space<vmem>>, vector<1x8x16xf32>
    %5 = vector.shape_cast %4 : vector<1x8x16xf32> to vector<8x16xf32>
    %c0_6 = arith.constant 0 : index
    %c0_7 = arith.constant 0 : index
    %c0_8 = arith.constant 0 : index
    %6 = vector.load %arg2[%c0_6, %c0_7, %c0_8] : memref<3x16x48xf32, #tpu.memory_space<vmem>>, vector<1x16x48xf32>
    %7 = vector.shape_cast %6 : vector<1x16x48xf32> to vector<16x48xf32>
    %cst = arith.constant dense<0.000000e+00> : vector<8x48xf32>
    %8 = tpu.matmul %1, %7, %cst {dimension_numbers = #tpu.dot_dimension_numbers<[1], [0], [0], [1], [0, 0, 1, 1], [], []>} : vector<8x16xf32>, vector<16x48xf32>, vector<8x48xf32> -> vector<8x48xf32>
    %c1_9 = arith.constant 1 : index
    %c0_10 = arith.constant 0 : index
    %c0_11 = arith.constant 0 : index
    %9 = vector.load %arg2[%c1_9, %c0_10, %c0_11] : memref<3x16x48xf32, #tpu.memory_space<vmem>>, vector<1x16x48xf32>
    %10 = vector.shape_cast %9 : vector<1x16x48xf32> to vector<16x48xf32>
    %cst_12 = arith.constant dense<0.000000e+00> : vector<8x48xf32>
    %11 = tpu.matmul %3, %10, %cst_12 {dimension_numbers = #tpu.dot_dimension_numbers<[1], [0], [0], [1], [0, 0, 1, 1], [], []>} : vector<8x16xf32>, vector<16x48xf32>, vector<8x48xf32> -> vector<8x48xf32>
    %12 = arith.addf %8, %11 : vector<8x48xf32>
    %c2_13 = arith.constant 2 : index
    %c0_14 = arith.constant 0 : index
    %c0_15 = arith.constant 0 : index
    %13 = vector.load %arg2[%c2_13, %c0_14, %c0_15] : memref<3x16x48xf32, #tpu.memory_space<vmem>>, vector<1x16x48xf32>
    %14 = vector.shape_cast %13 : vector<1x16x48xf32> to vector<16x48xf32>
    %cst_16 = arith.constant dense<0.000000e+00> : vector<8x48xf32>
    %15 = tpu.matmul %5, %14, %cst_16 {dimension_numbers = #tpu.dot_dimension_numbers<[1], [0], [0], [1], [0, 0, 1, 1], [], []>} : vector<8x16xf32>, vector<16x48xf32>, vector<8x48xf32> -> vector<8x48xf32>
    %16 = arith.addf %12, %15 : vector<8x48xf32>
    %c0_17 = arith.constant 0 : index
    %c0_18 = arith.constant 0 : index
    %17 = vector.load %arg3[%c0_17, %c0_18] : memref<1x48xf32, #tpu.memory_space<vmem>>, vector<1x48xf32>
    %18 = vector.broadcast %17 : vector<1x48xf32> to vector<8x48xf32>
    %19 = arith.addf %16, %18 : vector<8x48xf32>
    %20 = vector.extract_strided_slice %19 {offsets = [0, 0], sizes = [8, 16], strides = [1, 1]} : vector<8x48xf32> to vector<8x16xf32>
    %21 = vector.extract_strided_slice %19 {offsets = [0, 16], sizes = [8, 16], strides = [1, 1]} : vector<8x48xf32> to vector<8x16xf32>
    %22 = vector.extract_strided_slice %19 {offsets = [0, 32], sizes = [8, 16], strides = [1, 1]} : vector<8x48xf32> to vector<8x16xf32>
    %cst_19 = arith.constant dense<0.000000e+00> : vector<16x16xf32>
    %23 = tpu.matmul %21, %20, %cst_19 {dimension_numbers = #tpu.dot_dimension_numbers<[0], [0], [1], [1], [0, 1, 1, 1], [], []>} : vector<8x16xf32>, vector<8x16xf32>, vector<16x16xf32> -> vector<16x16xf32>
    %cst_20 = arith.constant 2.500000e-01 : f32
    %24 = vector.broadcast %cst_20 : f32 to vector<16x16xf32>
    %25 = arith.mulf %24, %23 : vector<16x16xf32>
    %cst_21 = arith.constant 0.000000e+00 : f32
    %26 = vector.broadcast %cst_21 : f32 to vector<16x16xf32>
    %27 = arith.subf %26, %25 : vector<16x16xf32>
    %28 = math.exp %27 : vector<16x16xf32>
    %cst_22 = arith.constant 1.000000e+00 : f32
    %29 = vector.broadcast %cst_22 : f32 to vector<16x16xf32>
    %30 = arith.addf %29, %28 : vector<16x16xf32>
    %31 = tpu.reciprocal %30 {approx = true} : vector<16x16xf32> -> vector<16x16xf32>
    %c0_23 = arith.constant 0 : index
    %c0_24 = arith.constant 0 : index
    %c0_25 = arith.constant 0 : index
    %32 = vector.load %arg20[%c0_23, %c0_24, %c0_25] : memref<1x16x16xf32, #tpu.memory_space<vmem>>, vector<1x16x16xf32>
    %33 = vector.shape_cast %32 : vector<1x16x16xf32> to vector<16x16xf32>
    %34 = vector.shape_cast %31 : vector<16x16xf32> to vector<1x16x16xf32>
    tpu.vector_store %arg20[%c0_23, %c0_24, %c0_25], %34 {strides = array<i32>} : memref<1x16x16xf32, #tpu.memory_space<vmem>>, vector<1x16x16xf32>,
    %cst_26 = arith.constant 0.000000e+00 : f32
    %35 = vector.broadcast %cst_26 : f32 to vector<16x16xf32>
    %36 = arith.cmpf ogt, %31, %35 : vector<16x16xf32>
    %c0_27 = arith.constant 0 : index
    %c0_28 = arith.constant 0 : index
    %37 = vector.load %arg4[%c0_27, %c0_28] : memref<16x8xf32, #tpu.memory_space<vmem>>, vector<16x8xf32>
    %cst_29 = arith.constant dense<0.000000e+00> : vector<16x16xf32>
    %38 = tpu.matmul %37, %22, %cst_29 {dimension_numbers = #tpu.dot_dimension_numbers<[1], [0], [0], [1], [0, 0, 1, 1], [], []>} : vector<16x8xf32>, vector<8x16xf32>, vector<16x16xf32> -> vector<16x16xf32>
    %c0_30 = arith.constant 0 : index
    %c0_31 = arith.constant 0 : index
    %39 = vector.load %arg5[%c0_30, %c0_31] : memref<16x1xf32, #tpu.memory_space<vmem>>, vector<16x1xf32>
    %40 = vector.broadcast %39 : vector<16x1xf32> to vector<16x16xf32>
    %41 = arith.addf %38, %40 : vector<16x16xf32>
    %42 = tpu.concatenate %41, %41, %41, %41 in 1 : vector<16x16xf32>, vector<16x16xf32>, vector<16x16xf32>, vector<16x16xf32> -> vector<16x64xf32>
    %c0_32 = arith.constant 0 : index
    %c0_33 = arith.constant 0 : index
    %43 = vector.load %arg6[%c0_32, %c0_33] : memref<16x64xf32, #tpu.memory_space<vmem>>, vector<16x64xf32>
    %44 = arith.mulf %42, %43 : vector<16x64xf32>
    %cst_34 = arith.constant dense<0.000000e+00> : vector<64xf32>
    %45 = vector.multi_reduction <add>, %44, %cst_34 [0] : vector<16x64xf32> to vector<64xf32>
    %46 = vector.shape_cast %45 : vector<64xf32> to vector<1x64xf32>
    %c0_35 = arith.constant 0 : index
    %c0_36 = arith.constant 0 : index
    %47 = vector.load %arg7[%c0_35, %c0_36] : memref<1x64xf32, #tpu.memory_space<vmem>>, vector<1x64xf32>
    %48 = arith.addf %46, %47 : vector<1x64xf32>
    %c0_37 = arith.constant 0 : index
    %c0_38 = arith.constant 0 : index
    %49 = vector.load %arg8[%c0_37, %c0_38] : memref<16x4xf32, #tpu.memory_space<vmem>>, vector<16x4xf32>
    %cst_39 = arith.constant dense<0.000000e+00> : vector<16x4xf32>
    %50 = tpu.matmul %41, %49, %cst_39 {dimension_numbers = #tpu.dot_dimension_numbers<[0], [0], [1], [1], [0, 1, 1, 1], [], []>} : vector<16x16xf32>, vector<16x4xf32>, vector<16x4xf32> -> vector<16x4xf32>
    %c0_40 = arith.constant 0 : index
    %c0_41 = arith.constant 0 : index
    %51 = vector.load %arg9[%c0_40, %c0_41] : memref<1x4xf32, #tpu.memory_space<vmem>>, vector<1x4xf32>
    %52 = vector.broadcast %51 : vector<1x4xf32> to vector<16x4xf32>
    %53 = arith.addf %50, %52 : vector<16x4xf32>
    %c0_42 = arith.constant 0 : index
    %c0_43 = arith.constant 0 : index
    %54 = vector.load %arg10[%c0_42, %c0_43] : memref<4x64xf32, #tpu.memory_space<vmem>>, vector<4x64xf32>
    %cst_44 = arith.constant dense<0.000000e+00> : vector<16x64xf32>
    %55 = tpu.matmul %53, %54, %cst_44 {dimension_numbers = #tpu.dot_dimension_numbers<[1], [0], [0], [1], [0, 0, 1, 1], [], []>} : vector<16x4xf32>, vector<4x64xf32>, vector<16x64xf32> -> vector<16x64xf32>
    %56 = vector.broadcast %48 : vector<1x64xf32> to vector<16x64xf32>
    %57 = arith.addf %55, %56 : vector<16x64xf32>
    %cst_45 = arith.constant 1.000000e-01 : f32
    %58 = vector.broadcast %cst_45 : f32 to vector<16x64xf32>
    %59 = arith.mulf %58, %57 : vector<16x64xf32>
    %60 = arith.maximumf %57, %59 : vector<16x64xf32>
    %61 = tpu.concatenate %31, %31, %31, %31 in 1 : vector<16x16xf32>, vector<16x16xf32>, vector<16x16xf32>, vector<16x16xf32> -> vector<16x64xf32>
    %cst_46 = arith.constant 0.000000e+00 : f32
    %62 = vector.broadcast %cst_46 : f32 to vector<16x64xf32>
    %63 = arith.cmpf ogt, %61, %62 : vector<16x64xf32>
    %cst_47 = arith.constant -1.000000e+09 : f32
    %64 = vector.broadcast %cst_47 : f32 to vector<16x64xf32>
    %65 = arith.select %63, %60, %64 : vector<16x64xi1>, vector<16x64xf32>
    %cst_48 = arith.constant dense<0xFF800000> : vector<64xf32>
    %66 = vector.multi_reduction <maximumf>, %65, %cst_48 [0] : vector<16x64xf32> to vector<64xf32>
    %67 = vector.shape_cast %66 : vector<64xf32> to vector<1x64xf32>
    %68 = vector.broadcast %67 : vector<1x64xf32> to vector<16x64xf32>
    %69 = arith.subf %65, %68 : vector<16x64xf32>
    %70 = math.exp %69 : vector<16x64xf32>
    %cst_49 = arith.constant dense<0.000000e+00> : vector<64xf32>
    %71 = vector.multi_reduction <add>, %70, %cst_49 [0] : vector<16x64xf32> to vector<64xf32>
    %72 = vector.shape_cast %71 : vector<64xf32> to vector<1x64xf32>
    %73 = tpu.reciprocal %72 {approx = true} : vector<1x64xf32> -> vector<1x64xf32>
    %74 = vector.broadcast %73 : vector<1x64xf32> to vector<16x64xf32>
    %75 = arith.mulf %70, %74 : vector<16x64xf32>
    %cst_50 = arith.constant dense<0.000000e+00> : vector<16x64xf32>
    %76 = tpu.matmul %41, %75, %cst_50 {dimension_numbers = #tpu.dot_dimension_numbers<[1], [0], [0], [1], [0, 0, 1, 1], [], []>} : vector<16x16xf32>, vector<16x64xf32>, vector<16x64xf32> -> vector<16x64xf32>
    %cst_51 = arith.constant 0.000000e+00 : f32
    %77 = vector.broadcast %cst_51 : f32 to vector<16x64xf32>
    %78 = arith.cmpf ogt, %76, %77 : vector<16x64xf32>
    %cst_52 = arith.constant 0.000000e+00 : f32
    %79 = vector.broadcast %cst_52 : f32 to vector<16x64xf32>
    %80 = arith.minimumf %76, %79 : vector<16x64xf32>
    %81 = math.exp %80 : vector<16x64xf32>
    %cst_53 = arith.constant 1.000000e+00 : f32
    %82 = vector.broadcast %cst_53 : f32 to vector<16x64xf32>
    %83 = arith.subf %81, %82 : vector<16x64xf32>
    %84 = arith.select %78, %76, %83 : vector<16x64xi1>, vector<16x64xf32>
    %c0_54 = arith.constant 0 : index
    %c0_55 = arith.constant 0 : index
    %c0_56 = arith.constant 0 : index
    %85 = vector.load %arg11[%c0_54, %c0_55, %c0_56] : memref<4x8x4xf32, #tpu.memory_space<vmem>>, vector<1x8x4xf32>
    %86 = vector.shape_cast %85 : vector<1x8x4xf32> to vector<8x4xf32>
    %87 = vector.extract_strided_slice %84 {offsets = [0, 0], sizes = [4, 16], strides = [1, 1]} : vector<16x64xf32> to vector<4x16xf32>
    %cst_57 = arith.constant dense<0.000000e+00> : vector<8x16xf32>
    %88 = tpu.matmul %86, %87, %cst_57 {dimension_numbers = #tpu.dot_dimension_numbers<[1], [0], [0], [1], [0, 0, 1, 1], [], []>} : vector<8x4xf32>, vector<4x16xf32>, vector<8x16xf32> -> vector<8x16xf32>
    %c0_58 = arith.constant 0 : index
    %c0_59 = arith.constant 0 : index
    %89 = vector.load %arg12[%c0_58, %c0_59] : memref<8x1xf32, #tpu.memory_space<vmem>>, vector<8x1xf32>
    %90 = vector.broadcast %89 : vector<8x1xf32> to vector<8x16xf32>
    %91 = arith.addf %88, %90 : vector<8x16xf32>
    %c1_60 = arith.constant 1 : index
    %c0_61 = arith.constant 0 : index
    %c0_62 = arith.constant 0 : index
    %92 = vector.load %arg11[%c1_60, %c0_61, %c0_62] : memref<4x8x4xf32, #tpu.memory_space<vmem>>, vector<1x8x4xf32>
    %93 = vector.shape_cast %92 : vector<1x8x4xf32> to vector<8x4xf32>
    %94 = vector.extract_strided_slice %84 {offsets = [4, 16], sizes = [4, 16], strides = [1, 1]} : vector<16x64xf32> to vector<4x16xf32>
    %cst_63 = arith.constant dense<0.000000e+00> : vector<8x16xf32>
    %95 = tpu.matmul %93, %94, %cst_63 {dimension_numbers = #tpu.dot_dimension_numbers<[1], [0], [0], [1], [0, 0, 1, 1], [], []>} : vector<8x4xf32>, vector<4x16xf32>, vector<8x16xf32> -> vector<8x16xf32>
    %96 = arith.addf %91, %95 : vector<8x16xf32>
    %c2_64 = arith.constant 2 : index
    %c0_65 = arith.constant 0 : index
    %c0_66 = arith.constant 0 : index
    %97 = vector.load %arg11[%c2_64, %c0_65, %c0_66] : memref<4x8x4xf32, #tpu.memory_space<vmem>>, vector<1x8x4xf32>
    %98 = vector.shape_cast %97 : vector<1x8x4xf32> to vector<8x4xf32>
    %99 = vector.extract_strided_slice %84 {offsets = [8, 32], sizes = [4, 16], strides = [1, 1]} : vector<16x64xf32> to vector<4x16xf32>
    %cst_67 = arith.constant dense<0.000000e+00> : vector<8x16xf32>
    %100 = tpu.matmul %98, %99, %cst_67 {dimension_numbers = #tpu.dot_dimension_numbers<[1], [0], [0], [1], [0, 0, 1, 1], [], []>} : vector<8x4xf32>, vector<4x16xf32>, vector<8x16xf32> -> vector<8x16xf32>
    %101 = arith.addf %96, %100 : vector<8x16xf32>
    %c3 = arith.constant 3 : index
    %c0_68 = arith.constant 0 : index
    %c0_69 = arith.constant 0 : index
    %102 = vector.load %arg11[%c3, %c0_68, %c0_69] : memref<4x8x4xf32, #tpu.memory_space<vmem>>, vector<1x8x4xf32>
    %103 = vector.shape_cast %102 : vector<1x8x4xf32> to vector<8x4xf32>
    %104 = vector.extract_strided_slice %84 {offsets = [12, 48], sizes = [4, 16], strides = [1, 1]} : vector<16x64xf32> to vector<4x16xf32>
    %cst_70 = arith.constant dense<0.000000e+00> : vector<8x16xf32>
    %105 = tpu.matmul %103, %104, %cst_70 {dimension_numbers = #tpu.dot_dimension_numbers<[1], [0], [0], [1], [0, 0, 1, 1], [], []>} : vector<8x4xf32>, vector<4x16xf32>, vector<8x16xf32> -> vector<8x16xf32>
    %106 = arith.addf %101, %105 : vector<8x16xf32>
    %c0_71 = arith.constant 0 : index
    %c0_72 = arith.constant 0 : index
    %107 = vector.load %arg13[%c0_71, %c0_72] : memref<1x8xf32, #tpu.memory_space<vmem>>, vector<1x8xf32>
    %cst_73 = arith.constant dense<0.000000e+00> : vector<1x16xf32>
    %108 = tpu.matmul %107, %106, %cst_73 {dimension_numbers = #tpu.dot_dimension_numbers<[1], [0], [0], [1], [0, 0, 1, 1], [], []>} : vector<1x8xf32>, vector<8x16xf32>, vector<1x16xf32> -> vector<1x16xf32>
    %c0_74 = arith.constant 0 : index
    %c0_75 = arith.constant 0 : index
    %109 = vector.load %arg14[%c0_74, %c0_75] : memref<1x1xf32, #tpu.memory_space<vmem>>, vector<1x1xf32>
    %110 = vector.broadcast %109 : vector<1x1xf32> to vector<1x16xf32>
    %111 = arith.addf %108, %110 : vector<1x16xf32>
    %c0_76 = arith.constant 0 : index
    %c0_77 = arith.constant 0 : index
    %112 = vector.load %arg15[%c0_76, %c0_77] : memref<8x1xf32, #tpu.memory_space<vmem>>, vector<8x1xf32>
    %cst_78 = arith.constant dense<0.000000e+00> : vector<16x1xf32>
    %113 = tpu.matmul %106, %112, %cst_78 {dimension_numbers = #tpu.dot_dimension_numbers<[0], [0], [1], [1], [0, 1, 1, 1], [], []>} : vector<8x16xf32>, vector<8x1xf32>, vector<16x1xf32> -> vector<16x1xf32>
    %c0_79 = arith.constant 0 : index
    %c0_80 = arith.constant 0 : index
    %114 = vector.load %arg16[%c0_79, %c0_80] : memref<1x1xf32, #tpu.memory_space<vmem>>, vector<1x1xf32>
    %115 = vector.broadcast %114 : vector<1x1xf32> to vector<16x1xf32>
    %116 = arith.addf %113, %115 : vector<16x1xf32>
    %117 = vector.broadcast %116 : vector<16x1xf32> to vector<16x16xf32>
    %118 = vector.broadcast %111 : vector<1x16xf32> to vector<16x16xf32>
    %119 = arith.addf %117, %118 : vector<16x16xf32>
    %cst_81 = arith.constant 1.000000e-01 : f32
    %120 = vector.broadcast %cst_81 : f32 to vector<16x16xf32>
    %121 = arith.mulf %120, %119 : vector<16x16xf32>
    %122 = arith.maximumf %119, %121 : vector<16x16xf32>
    %cst_82 = arith.constant -1.000000e+09 : f32
    %123 = vector.broadcast %cst_82 : f32 to vector<16x16xf32>
    %124 = arith.select %36, %122, %123 : vector<16x16xi1>, vector<16x16xf32>
    %cst_83 = arith.constant dense<0xFF800000> : vector<16xf32>
    %125 = vector.multi_reduction <maximumf>, %124, %cst_83 [0] : vector<16x16xf32> to vector<16xf32>
    %126 = vector.shape_cast %125 : vector<16xf32> to vector<1x16xf32>
    %127 = vector.broadcast %126 : vector<1x16xf32> to vector<16x16xf32>
    %128 = arith.subf %124, %127 : vector<16x16xf32>
    %129 = math.exp %128 : vector<16x16xf32>
    %cst_84 = arith.constant dense<0.000000e+00> : vector<16xf32>
    %130 = vector.multi_reduction <add>, %129, %cst_84 [0] : vector<16x16xf32> to vector<16xf32>
    %131 = vector.shape_cast %130 : vector<16xf32> to vector<1x16xf32>
    %132 = tpu.reciprocal %131 {approx = true} : vector<1x16xf32> -> vector<1x16xf32>
    %133 = vector.broadcast %132 : vector<1x16xf32> to vector<16x16xf32>
    %134 = arith.mulf %129, %133 : vector<16x16xf32>
    %cst_85 = arith.constant dense<0.000000e+00> : vector<8x16xf32>
    %135 = tpu.matmul %106, %134, %cst_85 {dimension_numbers = #tpu.dot_dimension_numbers<[1], [0], [0], [1], [0, 0, 1, 1], [], []>} : vector<8x16xf32>, vector<16x16xf32>, vector<8x16xf32> -> vector<8x16xf32>
    %cst_86 = arith.constant 0.000000e+00 : f32
    %136 = vector.broadcast %cst_86 : f32 to vector<8x16xf32>
    %137 = arith.cmpf ogt, %135, %136 : vector<8x16xf32>
    %cst_87 = arith.constant 0.000000e+00 : f32
    %138 = vector.broadcast %cst_87 : f32 to vector<8x16xf32>
    %139 = arith.minimumf %135, %138 : vector<8x16xf32>
    %140 = math.exp %139 : vector<8x16xf32>
    %cst_88 = arith.constant 1.000000e+00 : f32
    %141 = vector.broadcast %cst_88 : f32 to vector<8x16xf32>
    %142 = arith.subf %140, %141 : vector<8x16xf32>
    %143 = arith.select %137, %135, %142 : vector<8x16xi1>, vector<8x16xf32>
    %cst_89 = arith.constant dense<0xFF800000> : vector<16xf32>
    %144 = vector.multi_reduction <maximumf>, %143, %cst_89 [0] : vector<8x16xf32> to vector<16xf32>
    %145 = vector.shape_cast %144 : vector<16xf32> to vector<1x16xf32>
    %146 = vector.broadcast %145 : vector<1x16xf32> to vector<8x16xf32>
    %147 = arith.subf %143, %146 : vector<8x16xf32>
    %148 = math.exp %147 : vector<8x16xf32>
    %cst_90 = arith.constant dense<0.000000e+00> : vector<16xf32>
    %149 = vector.multi_reduction <add>, %148, %cst_90 [0] : vector<8x16xf32> to vector<16xf32>
    %150 = vector.shape_cast %149 : vector<16xf32> to vector<1x16xf32>
    %151 = math.log %150 : vector<1x16xf32>
    %152 = vector.broadcast %151 : vector<1x16xf32> to vector<8x16xf32>
    %153 = arith.subf %147, %152 : vector<8x16xf32>
    %c0_91 = arith.constant 0 : index
    %c0_92 = arith.constant 0 : index
    %154 = vector.load %arg17[%c0_91, %c0_92] : memref<16x16xf32, #tpu.memory_space<vmem>>, vector<16x16xf32>
    %cst_93 = arith.constant dense<0.000000e+00> : vector<8x16xf32>
    %155 = tpu.matmul %153, %154, %cst_93 {dimension_numbers = #tpu.dot_dimension_numbers<[1], [0], [0], [1], [0, 0, 1, 1], [], []>} : vector<8x16xf32>, vector<16x16xf32>, vector<8x16xf32> -> vector<8x16xf32>
    %c0_94 = arith.constant 0 : index
    %c0_95 = arith.constant 0 : index
    %156 = vector.load %arg18[%c0_94, %c0_95] : memref<1x16xf32, #tpu.memory_space<vmem>>, vector<1x16xf32>
    %157 = vector.broadcast %156 : vector<1x16xf32> to vector<8x16xf32>
    %158 = arith.addf %155, %157 : vector<8x16xf32>
    %c0_96 = arith.constant 0 : index
    %c0_97 = arith.constant 0 : index
    %c0_98 = arith.constant 0 : index
    %159 = vector.load %arg19[%c0_96, %c0_97, %c0_98] : memref<1x8x16xf32, #tpu.memory_space<vmem>>, vector<1x8x16xf32>
    %160 = vector.shape_cast %159 : vector<1x8x16xf32> to vector<8x16xf32>
    %161 = vector.shape_cast %158 : vector<8x16xf32> to vector<1x8x16xf32>
    tpu.vector_store %arg19[%c0_96, %c0_97, %c0_98], %161 {strides = array<i32>} : memref<1x8x16xf32, #tpu.memory_space<vmem>>, vector<1x8x16xf32>,
    return
  }
  func.func @transform_0(%arg0: i32) -> (i32, i32, i32) {
    %c0_i32 = arith.constant 0 : i32
    %c0_i32_0 = arith.constant 0 : i32
    %c0_i32_1 = arith.constant 0 : i32
    return %arg0, %c0_i32, %c0_i32_0 : i32, i32, i32
  }
  func.func @transform_1(%arg0: i32) -> (i32, i32, i32) {
    %c0_i32 = arith.constant 0 : i32
    %c0_i32_0 = arith.constant 0 : i32
    %c0_i32_1 = arith.constant 0 : i32
    %c0_i32_2 = arith.constant 0 : i32
    return %c0_i32, %c0_i32_0, %c0_i32_1 : i32, i32, i32
  }
  func.func @transform_2(%arg0: i32) -> (i32, i32) {
    %c0_i32 = arith.constant 0 : i32
    %c0_i32_0 = arith.constant 0 : i32
    %c0_i32_1 = arith.constant 0 : i32
    return %c0_i32, %c0_i32_0 : i32, i32
  }
  func.func @transform_3(%arg0: i32) -> (i32, i32) {
    %c0_i32 = arith.constant 0 : i32
    %c0_i32_0 = arith.constant 0 : i32
    %c0_i32_1 = arith.constant 0 : i32
    return %c0_i32, %c0_i32_0 : i32, i32
  }
  func.func @transform_4(%arg0: i32) -> (i32, i32) {
    %c0_i32 = arith.constant 0 : i32
    %c0_i32_0 = arith.constant 0 : i32
    %c0_i32_1 = arith.constant 0 : i32
    return %c0_i32, %c0_i32_0 : i32, i32
  }
  func.func @transform_5(%arg0: i32) -> (i32, i32) {
    %c0_i32 = arith.constant 0 : i32
    %c0_i32_0 = arith.constant 0 : i32
    %c0_i32_1 = arith.constant 0 : i32
    return %c0_i32, %c0_i32_0 : i32, i32
  }
  func.func @transform_6(%arg0: i32) -> (i32, i32) {
    %c0_i32 = arith.constant 0 : i32
    %c0_i32_0 = arith.constant 0 : i32
    %c0_i32_1 = arith.constant 0 : i32
    return %c0_i32, %c0_i32_0 : i32, i32
  }
  func.func @transform_7(%arg0: i32) -> (i32, i32) {
    %c0_i32 = arith.constant 0 : i32
    %c0_i32_0 = arith.constant 0 : i32
    %c0_i32_1 = arith.constant 0 : i32
    return %c0_i32, %c0_i32_0 : i32, i32
  }
  func.func @transform_8(%arg0: i32) -> (i32, i32) {
    %c0_i32 = arith.constant 0 : i32
    %c0_i32_0 = arith.constant 0 : i32
    %c0_i32_1 = arith.constant 0 : i32
    return %c0_i32, %c0_i32_0 : i32, i32
  }
  func.func @transform_9(%arg0: i32) -> (i32, i32) {
    %c0_i32 = arith.constant 0 : i32
    %c0_i32_0 = arith.constant 0 : i32
    %c0_i32_1 = arith.constant 0 : i32
    return %c0_i32, %c0_i32_0 : i32, i32
  }
  func.func @transform_10(%arg0: i32) -> (i32, i32, i32) {
    %c0_i32 = arith.constant 0 : i32
    %c0_i32_0 = arith.constant 0 : i32
    %c0_i32_1 = arith.constant 0 : i32
    %c0_i32_2 = arith.constant 0 : i32
    return %c0_i32, %c0_i32_0, %c0_i32_1 : i32, i32, i32
  }
  func.func @transform_11(%arg0: i32) -> (i32, i32) {
    %c0_i32 = arith.constant 0 : i32
    %c0_i32_0 = arith.constant 0 : i32
    %c0_i32_1 = arith.constant 0 : i32
    return %c0_i32, %c0_i32_0 : i32, i32
  }
  func.func @transform_12(%arg0: i32) -> (i32, i32) {
    %c0_i32 = arith.constant 0 : i32
    %c0_i32_0 = arith.constant 0 : i32
    %c0_i32_1 = arith.constant 0 : i32
    return %c0_i32, %c0_i32_0 : i32, i32
  }
  func.func @transform_13(%arg0: i32) -> (i32, i32) {
    %c0_i32 = arith.constant 0 : i32
    %c0_i32_0 = arith.constant 0 : i32
    %c0_i32_1 = arith.constant 0 : i32
    return %c0_i32, %c0_i32_0 : i32, i32
  }
  func.func @transform_14(%arg0: i32) -> (i32, i32) {
    %c0_i32 = arith.constant 0 : i32
    %c0_i32_0 = arith.constant 0 : i32
    %c0_i32_1 = arith.constant 0 : i32
    return %c0_i32, %c0_i32_0 : i32, i32
  }
  func.func @transform_15(%arg0: i32) -> (i32, i32) {
    %c0_i32 = arith.constant 0 : i32
    %c0_i32_0 = arith.constant 0 : i32
    %c0_i32_1 = arith.constant 0 : i32
    return %c0_i32, %c0_i32_0 : i32, i32
  }
  func.func @transform_16(%arg0: i32) -> (i32, i32) {
    %c0_i32 = arith.constant 0 : i32
    %c0_i32_0 = arith.constant 0 : i32
    %c0_i32_1 = arith.constant 0 : i32
    return %c0_i32, %c0_i32_0 : i32, i32
  }
  func.func @transform_17(%arg0: i32) -> (i32, i32) {
    %c0_i32 = arith.constant 0 : i32
    %c0_i32_0 = arith.constant 0 : i32
    %c0_i32_1 = arith.constant 0 : i32
    return %c0_i32, %c0_i32_0 : i32, i32
  }
  func.func @transform_18(%arg0: i32) -> (i32, i32, i32) {
    %c0_i32 = arith.constant 0 : i32
    %c0_i32_0 = arith.constant 0 : i32
    %c0_i32_1 = arith.constant 0 : i32
    return %arg0, %c0_i32, %c0_i32_0 : i32, i32, i32
  }
  func.func @transform_19(%arg0: i32) -> (i32, i32, i32) {
    %c0_i32 = arith.constant 0 : i32
    %c0_i32_0 = arith.constant 0 : i32
    %c0_i32_1 = arith.constant 0 : i32
    return %arg0, %c0_i32, %c0_i32_0 : i32, i32, i32
  }
}

</mosaic_0001>

<bundles_post_ra>
// kernel: vertical_gat_forward.1
= control target key start
LH: loop header
LB: loop body
LE: loop exit
PB: predicated region body
PF: predicated region fallthrough
CT: control target
= control target key end

     0   :  { %s3191_s0 = inlined_call_operand.vmem [shape: f32[2,10,16], index: 0, kind: input, shape index: {}]   ;;  %s3192_s1 = inlined_call_operand.vmem [shape: f32[3,16,48], index: 1, kind: input, shape index: {}]   ;;  %s3193_s2 = inlined_call_operand.vmem [shape: f32[1,48], index: 2, kind: input, shape index: {}]   ;;  %s3194_s3 = inlined_call_operand.vmem [shape: f32[16,8], index: 3, kind: input, shape index: {}]   ;;  %s3195_s4 = inlined_call_operand.vmem [shape: f32[16,1], index: 4, kind: input, shape index: {}]   ;;  %s3196_s5 = inlined_call_operand.vmem [shape: f32[16,64], index: 5, kind: input, shape index: {}]   ;;  %s3197_s6 = inlined_call_operand.vmem [shape: f32[1,64], index: 6, kind: input, shape index: {}]   ;;  %s3198_s7 = inlined_call_operand.vmem [shape: f32[16,4], index: 7, kind: input, shape index: {}]   ;;  %s3199_s8 = inlined_call_operand.vmem [shape: f32[1,4], index: 8, kind: input, shape index: {}]   ;;  %s3200_s9 = inlined_call_operand.vmem [shape: f32[4,64], index: 9, kind: input, shape index: {}]   ;;  %s3201_s10 = inlined_call_operand.vmem [shape: f32[4,8,4], index: 10, kind: input, shape index: {}]   ;;  %s3202_s11 = inlined_call_operand.vmem [shape: f32[8,1], index: 11, kind: input, shape index: {}]   ;;  %s3203_s12 = inlined_call_operand.vmem [shape: f32[1,8], index: 12, kind: input, shape index: {}]   ;;  %s3204_s13 = inlined_call_operand.<no memory space> [shape: f32[1,1], index: 13, kind: input, shape index: {}]   ;;  %s3205_s14 = inlined_call_operand.vmem [shape: f32[8,1], index: 14, kind: input, shape index: {}]   ;;  %s3206_s16 = inlined_call_operand.vmem [shape: f32[16,16], index: 16, kind: input, shape index: {}]   ;;  %s3207_s17 = inlined_call_operand.vmem [shape: f32[1,16], index: 17, kind: input, shape index: {}]   ;;  %s3208_s18 = inlined_call_operand.hbm [shape: f32[2,8,16], index: 18, kind: output, shape index: {0}]   ;;  %s3209_s19 = inlined_call_operand.vmem [shape: f32[2,16,16], index: 19, kind: output, shape index: {1}]   ;;  %s3210_s15 = inlined_call_operand.<no memory space> [shape: f32[1,1], index: 15, kind: input, shape index: {}]  }
   0x1   :  { %3217 = sst [smem:[#allocation8_spill]] %s3191_s0  ;;  %v25_v0 = vstv %s3204_s13  ;;  %v27_v1 = vstv %s3210_s15 }
   0x2   :  { %3218 = sst [smem:[#allocation9_spill]] %s3192_s1  ;;  %26 = vst [vmem:[#allocation2] sm:$0x1] %v25_v0  ;;  %28 = vst [vmem:[#allocation3] sm:$0x1] %v27_v1 }
   0x3   :  { %3219 = sst [smem:[#allocation10_spill]] %s3193_s2 }
   0x4   :  { %3220 = sst [smem:[#allocation11_spill]] %s3194_s3 }
   0x5   :  { %3221 = sst [smem:[#allocation12_spill]] %s3195_s4 }
   0x6   :  { %3222 = sst [smem:[#allocation13_spill]] %s3196_s5 }
   0x7   :  { %3223 = sst [smem:[#allocation14_spill]] %s3197_s6 }
   0x8   :  { %29 = vsyncpa [#allocation5], 0 }
   0x9   :  { %31 = vsyncpa [#allocation5 + $0x1], 0  ;;  %s2854_s1 = smov 0   ;;  %s2856_s22 = smov 0  }
   0xa   :  { %s2858_s2 = smov 0   ;;  %s2860_s23 = smov 0  }
   0xb LB: > { %s2875_s13 = sadd.s32 4294967295, %s2735_s23   ;;  %s2367_s15 = sadd.s32 4294967294, %s2735_s23   ;;  %s2735_s23 = sphi %s2860_s23, %s3241_s23   ;;  %s2731_s2 = sphi %s2858_s2, %s3240_s2   ;;  %s2727_s22 = sphi %s2856_s22, %s3239_s22   ;;  %s2723_s1 = sphi %s2854_s1, %s3238_s1  }
   0xc   : > { %s2879_s24 = sadd.s32 1, %s2735_s23   ;;  %s427_s25 = sadd.s32 1, %s2731_s2 }
   0xd   : > { %s424_s3 = ssub.s32 %s2735_s23, %s2879_s24  ;;  %p437_p0 = scmp.ne.s32.totalorder %s2731_s2, %s2727_s22 }
   0xe   : > { %p425_p1 = scmp.eq.s32.totalorder %s424_s3, 0  ;;  %p438_p2 = scmp.eq.s32.totalorder %s2875_s13, 1 }
   0xf   : > { %p443_p3 = scmp.ne.s32.totalorder %s2727_s22, %s2723_s1  ;;  %p444_p4 = scmp.eq.s32.totalorder %s2367_s15, 1 }
  0x10   : > { %s2890_s26 = scalar_select %p425_p1, %s2731_s2, %s427_s25  }
  0x11   : > { %p2892_p5 = por %p438_p2, %p437_p0  ;;  %p2896_p6 = por %p444_p4, %p443_p3 }
  0x12   : > { %3224 = sst [smem:[#allocation7_spill]] %s2890_s26  ;;  %p2370_p7 = scmp.ge.s32.totalorder %s2735_s23, 1 }
  0x13   : > { %p547_p8 = scmp.lt.s32.totalorder %s2735_s23, 3 }
  0x15   : > { %p548_p9 = pnand %p2370_p7, %p547_p8 }
  0x16   : > { %s3227_s30 = sld [smem:[#allocation9_spill]] (!%p548_p9)  ;;  %v2737_v5 = vmov (!%p548_p9), 0.0|0.0   ;;  %p608_p10 = scmp.lt.s32.totalorder (!%p548_p9), %s2875_s13, 1  ;;  %vm2738_vm0 = vmmov (!%p548_p9), 0   ;;  %v2739_v9 = vmov (!%p548_p9), 0.0   ;;  %v2740_v13 = vmov (!%p548_p9), 0  }
  0x17   : > { %551 = sbr.rel (%p548_p9) target bundleno = 2865 (0xb31), region = 92  ;;  %2562 = vmatprep.subr.bf16.mxu0 (!%p548_p9), %v2737_v5  ;;  %2565 = vmatprep.subr.bf16.mxu1 (!%p548_p9), %v2737_v5  ;;  %s3228_s4 = sld [smem:[#allocation12_spill]] (!%p548_p9)  ;;  %vm626_vm1 = vcmask (!%p548_p9), 130048   ;;  %vm894_vm2 = vcmask (!%p548_p9), 64512   ;;  %v1134_v41 = vld [vmem:[%s3198_s7] sm:$0xff] (!%p548_p9)  ;;  %v1135_v42 = vld [vmem:[%s3198_s7 + $0x8] sm:$0xff] (!%p548_p9) }
  0x18   : > { %2472 = vmatprep.mubr.msk.f32.mxu0 (!%p548_p9), %vm2738_vm0, %v2739_v9  ;;  %2479 = vmatprep.mubr.msk.f32.mxu1 (!%p548_p9), %vm2738_vm0, %v2739_v9  ;;  %s3229_s20 = sld [smem:[#allocation8_spill]] (!%p548_p9)  ;;  %s3216_s26 = smov (!%p548_p9), 96   ;;  %v2571_v43 = vpack.c.bf16 (!%p548_p9), %v1135_v42, %v1134_v41  ;;  %v1256_v60 = vld [vmem:[%s3200_s9] sm:$0xf] (!%p548_p9)  ;;  %vm1268_vm3 = vcmask (!%p548_p9), 1043456   ;;  %vm1261_vm4 = vcmask (!%p548_p9), 31744  }
  0x19   : > { %2642 = vset.pattern.permute.xlu1 (!%p548_p9), %v2740_v13  ;;  %2641 = vset.pattern.permute.xlu0 (!%p548_p9), %v2740_v13  ;;  %v2388_v61 = vld [vmem:[%s3199_s8] ss:$0 sm:$0xff] (!%p548_p9)  ;;  %vm1112_vm5 = vcmask (!%p548_p9), 261120   ;;  %vm1115_vm6 = vcmask (!%p548_p9), 392192   ;;  %s3233_s5 = sld [smem:[#allocation13_spill]] (!%p548_p9)  ;;  %vm1122_vm7 = vcmask (!%p548_p9), 523264  }
  0x1a   : > { %s3234_s6 = sld [smem:[#allocation14_spill]] (!%p548_p9)  ;;  %s2418_s15 = sshll.u32 (!%p548_p9), %s2875_s13, 7 }
  0x1c   : > { %v2376_v2 = vld [vmem:[%s3227_s30 + $0x10] sm:$0xff] (!%p548_p9)  ;;  %v2377_v3 = vld [vmem:[%s3227_s30 + $0x18] sm:$0xff] (!%p548_p9)  ;;  %v621_v4 = vld [vmem:[%s3227_s30] sm:$0xff] (!%p548_p9) }
  0x1d   : > { %v2563_v6 = vpack.c.bf16 (!%p548_p9), %v2377_v3, %v2376_v2  ;;  %v622_v7 = vld [vmem:[%s3227_s30 + $0x8] sm:$0xff] (!%p548_p9)  ;;  %v2380_v10 = vld [vmem:[%s3227_s30 + $0x20] sm:$0xff] (!%p548_p9) }
  0x1e   : > { %v2566_v8 = vpack.c.bf16 %v622_v7, %v621_v4  ;;  %v2381_v11 = vld [vmem:[%s3227_s30 + $0x28] sm:$0xff]  ;;  %s2931_s25 = scalar_select %p608_p10, %s2875_s13, 1  ;;  %v994_v29 = vld [vmem:[%s3228_s4] sm:$0xff] }
  0x1f   : > { %v995_v12 = vld [vmem:[%s3228_s4 + $0x8] sm:$0xff]  ;;  %2564 = vmatpush3.bf16.msra.mxu0 %v2563_v6  ;;  %v2569_v14 = vpack.c.bf16 %v2381_v11, %v2380_v10  ;;  %s3230_s30 = sld [smem:[#allocation11_spill]]  ;;  %s2747_s13 = smov [#allocation4]  }
  0x20   : > { %2567 = vmatpush3.bf16.msra.mxu1 %v2566_v8  ;;  %2568 = vmatprep.subr.bf16.mxu0 %v2737_v5  ;;  %s3214_s3 = sshll.u32 %s2931_s25, 4  ;;  %v1119_v13 = vld [vmem:[%s3233_s5 + $0x8] sm:$0xff] }
  0x21   : > { %1003 = vperm.xlu1 %2642, %v995_v12   ;;  %s612_s21 = scalar_lea.vmem %s3229_s20, %s3214_s3  ;;  %s3231_s20 = sld [smem:[#allocation10_spill]] }
  0x22   : > { %v619_v15 = vld [vmem:[%s612_s21 + $0x1] sm:$0xff]  ;;  %s2743_s3 = smov 16  }
  0x23   : > { %v618_v16 = vld [vmem:[%s612_s21] sm:$0xff]  ;;  %2473 = vmatmul.mubr.msk.f32.vlgmr.msra.gmra.mrb[0].mxu0 %vm626_vm1, %v619_v15 }
  0x24   : > { %2480 = vmatmul.mubr.msk.f32.vlgmr.msra.gmra.mrb[0].mxu1 %vm626_vm1, %v618_v16  ;;  %2570 = vmatpush3.bf16.msra.mxu0 %v2569_v14  ;;  %v620_v17 = vld [vmem:[%s612_s21 + $0x2] sm:$0xff]  ;;  %s3215_s21 = smov 112  }
  0x25   : > { %2486 = vmatprep.mubr.msk.f32.mxu0 %vm2738_vm0, %v2739_v9  ;;  %v992_v18 = vld [vmem:[%s3230_s30] sm:$0xff]  ;;  %v993_v33 = vld [vmem:[%s3230_s30 + $0x8] sm:$0xff] }
  0x27   : > { %2487 = vmatmul.mubr.msk.f32.vlgmr.msra.gmra.mrb[2].mxu0 %vm626_vm1, %v620_v17  ;;  %v2383_v25 = vld [vmem:[%s3231_s20] ss:$0 sm:$0xff]  ;;  %s3232_s20 = sshll.u32 %s2931_s25, 4  ;;  %s2746_s25 = smov 80  }
  0x28   : > { %2496 = vmatprep.mubr.msk.f32.mxu0 %vm894_vm2, %v992_v18  ;;  %s617_s0 = scalar_lea.vmem %s3209_s19, %s3232_s20  ;;  %v1118_v17 = vld [vmem:[%s3233_s5] sm:$0xff]  ;;  %s3148_s5 = scalar_lea.hbm %s3208_s18, %s2418_s15 }
  0xa0   : > { %v1004_v30 = vpop.permute.xlu1 %1003 }
  0xf6   : > { %v696_v19 = vpop.f32.mrb[0].mxu0 }
  0xf7   : > { %v769_v20 = vpop.f32.mrb[0].mxu1  ;;  %v2474_v22 = vpop.f32.mrb[1].mxu0 }
  0xf8   : > { %v770_v21 = vadd.f32 %v769_v20, %v696_v19  ;;  %v2481_v23 = vpop.f32.mrb[1].mxu1 }
  0xfa   : > { %v845_v24 = vpop.f32.mrb[2].mxu0 }
  0xfb   : > { %v849_v26 = vadd.f32 %v845_v24, %v770_v21  ;;  %v2488_v27 = vpop.f32.mrb[3].mxu0 }
  0xfd   : > { %v857_v28 = vadd.f32 %v2383_v25, %v849_v26 }
  0xff   : > { %859 = vrot.lane.b32.xlu1 %v857_v28, %s3215_s21  ;;  %1006 = vrot.lane.b32.xlu0 %v857_v28, %s3216_s26  ;;  %s2744_s21 = smov 32   ;;  %s2745_s26 = smov 48  }
 0x100   : > { %2489 = vmatprep.subr.mxu1 %v857_v28 }
 0x101   : > { %2490 = vmatpush3.msra.mxu1 %v857_v28  ;;  %v1257_v28 = vlaneseq }
 0x102   : > { %2572 = vmatprep.subr.bf16.mxu1 %v2571_v43 }
 0x103   : > { %998 = vperm.xlu0 %2641, %v994_v29  }
 0x171   : > { %v860_v31 = vpop.permute.xlu1 %859  ;;  %v1007_v32 = vpop.permute.xlu0 %1006 }
 0x172   : > { %862 = vxpose.xlu1.b32.start.end [1/1] (short) (narrow) %v860_v31, 16  ;;  %2494 = vmatprep.subr.mxu0 %v1007_v32 }
 0x173   : > { %2495 = vmatpush3.msra.mxu0 %v1007_v32  ;;  %v1258_v32 = vshrl.u32 %v1257_v28, 7 }
 0x174   : > { %2497 = vmatmul.mubr.msk.f32.vlgmr.msra.gmra.mrb[4].mxu0 %vm894_vm2, %v993_v33  ;;  %2506 = vmatprep.subr.msk.mxu0 %vm1268_vm3, %v1256_v60  ;;  %v1132_v33 = vld [vmem:[%s3234_s6] sm:$0x1] }
 0x175   : > { %2507 = vmatpush3.msk.msra.mxu0 %vm1268_vm3, %v1256_v60 }
 0x176   : > { %2518 = vmatprep.subr.mxu0 %v2739_v9 }
 0x182   : > { %v999_v36 = vpop.permute.xlu0 %998 }
 0x1f2   : > { %v878_v34 = vpop.trf.xlu1 }
 0x1f3   : > { %2491 = vmatprep.mubr.msk.f32.mxu1 %vm894_vm2, %v878_v34 }
 0x1f6   : > { %v879_v35 = vpop.trf.xlu1 }
 0x1f7   : > { %2492 = vmatmul.mubr.msk.f32.vlgmr.msra.gmra.mrb[2].mxu1 %vm894_vm2, %v879_v35 }
 0x1f8   : > { %2574 = vmatpush3.bf16.msra.mxu1 %v2571_v43 }
 0x247   : > { %v2498_v37 = vpop.f32.mrb[4].mxu0 }
 0x248   : > { %v2963_v38 = vadd.f32 %v2498_v37, %v1004_v30  ;;  %v1081_v39 = vpop.f32.mrb[5].mxu0  ;;  %v3048_v37 = vsub.s32 0, %v1258_v32 }
 0x249   : > { %v2965_v40 = vadd.f32 %v1081_v39, %v999_v36 }
 0x24a   : > { %1094 = vrot.lane.b32.xlu1 %v2963_v38, %s2743_s3 }
 0x24b   : > { %1143 = vxpose.xlu0.b32.start [1/2] (short) (narrow) %v2965_v40, 16 }
 0x24e   : > { %1098 = vrot.lane.b32.xlu1 %v2965_v40, %s2744_s21 }
 0x24f   : > { %1144 = vxpose.xlu0.b32.end [2/2] (short) (narrow) %v2963_v38, 16 }
 0x252   : > { %1104 = vrot.lane.b32.xlu1 %v2965_v40, %s2745_s26 }
 0x278   : > { %1092 = vrot.lane.b32.xlu0 %v2965_v40, %s2743_s3 }
 0x27c   : > { %1100 = vrot.lane.b32.xlu0 %v2963_v38, %s2744_s21 }
 0x280   : > { %1106 = vrot.lane.b32.xlu0 %v2963_v38, %s2745_s26 }
 0x2bc   : > { %v1095_v3 = vpop.permute.xlu1 %1094 }
 0x2bd   : > { %v1111_v10 = vsel %vm626_vm1, %v2963_v38, %v1095_v3 }
 0x2c0   : > { %v1099_v6 = vpop.permute.xlu1 %1098 }
 0x2c4   : > { %v1105_v15 = vpop.permute.xlu1 %1104 }
 0x2ca   : > { %v2493_v44 = vpop.f32.mrb[2].mxu1 }
 0x2cb   : > { %v1159_v45 = vpop.trf.xlu0  ;;  %v977_v46 = vmul.f32 0.25, %v2493_v44  ;;  %v967_v47 = vpop.f32.mrb[3].mxu1 }
 0x2cc   : > { %2503 = vmatprep.mubr.msk.f32.mxu1 %vm626_vm1, %v1159_v45  ;;  %v976_v48 = vmul.f32 0.25, %v967_v47 }
 0x2cd   : > { %v979_v49 = vsub.f32 0.0, %v977_v46 }
 0x2ce   : > { %v978_v50 = vsub.f32 0.0, %v976_v48 }
 0x2cf   : > { %v1160_v51 = vpop.trf.xlu0  ;;  %v982_v52 = vmul.f32 1.442695, %v979_v49 }
 0x2d0   : > { %2504 = vmatmul.mubr.msk.f32.vlgmr.msra.gmra.mrb[4].mxu1 %vm626_vm1, %v1160_v51  ;;  %v980_v53 = vmul.f32 1.442695, %v978_v50 }
 0x2d1   : > { %2515 = vmatprep.mubr.msk.f32.mxu1 %vm626_vm1, %v2965_v40  ;;  %2643 = vpow2.f32 %v982_v52 }
 0x2d2   : > { %2645 = vpow2.f32 %v980_v53 }
 0x2db   : > { %v2644_v54 = vpop.eup %2643 }
 0x2dc   : > { %v2646_v55 = vpop.eup %2645  ;;  %v985_v56 = vadd.f32 1.0, %v2644_v54 }
 0x2dd   : > { %v984_v57 = vadd.f32 1.0, %v2646_v55 }
 0x2de   : > { %2647 = vrcp.f32 %v985_v56 }
 0x2df   : > { %2649 = vrcp.f32 %v984_v57 }
 0x2e8   : > { %v2996_v58 = vpop.eup %2647 }
 0x2e9   : > { %v2998_v59 = vpop.eup %2649  ;;  %989 = vst.msk [vmem:[%s617_s0 + $0x8] sm:$0xff] %vm626_vm1, %v2996_v58  ;;  %1355 = vrot.lane.b32.xlu0 %v2996_v58, %s2743_s3  ;;  %vm991_vm13 = vcmp.gt.f32.partialorder %v2996_v58, 0.0 }
 0x2ea   : > { %988 = vst.msk [vmem:[%s617_s0] sm:$0xff] %vm626_vm1, %v2998_v59  ;;  %1353 = vrot.lane.b32.xlu1 %v2998_v59, %s2743_s3  ;;  %v1093_v2 = vpop.permute.xlu0 %1092  ;;  %s3236_s0 = smov 112   ;;  %vm990_vm12 = vcmp.gt.f32.partialorder %v2998_v59, 0.0 }
 0x2eb   : > { %v1110_v7 = vsel %vm626_vm1, %v2965_v40, %v1093_v2 }
 0x2ec   : > { %v1113_v11 = vsel %vm1112_vm5, %v1110_v7, %v1099_v6 }
 0x2ed   : > { %1361 = vrot.lane.b32.xlu0 %v2996_v58, %s2744_s21  ;;  %v1116_v16 = vsel %vm1115_vm6, %v1113_v11, %v1105_v15 }
 0x2ee   : > { %1359 = vrot.lane.b32.xlu1 %v2998_v59, %s2744_s21  ;;  %v1101_v4 = vpop.permute.xlu0 %1100  ;;  %v1120_v19 = vmul.f32 %v1118_v17, %v1116_v16  ;;  %s3235_s21 = smov 96  }
 0x2ef   : > { %v1114_v12 = vsel %vm1112_vm5, %v1111_v10, %v1101_v4 }
 0x2f0   : > { %v1123_v21 = vsel %vm1122_vm7, %v1120_v19, 0.0 }
 0x2f1   : > { %1367 = vrot.lane.b32.xlu0 %v2996_v58, %s2745_s26 }
 0x2f2   : > { %1365 = vrot.lane.b32.xlu1 %v2998_v59, %s2745_s26  ;;  %v1107_v8 = vpop.permute.xlu0 %1106 }
 0x2f3   : > { %v1117_v14 = vsel %vm1115_vm6, %v1114_v12, %v1107_v8 }
 0x2f4   : > { %v1121_v18 = vmul.f32 %v1119_v13, %v1117_v14 }
 0x2f6   : > { %v1124_v20 = vsel %vm1122_vm7, %v1121_v18, 0.0 }
 0x2f7   : > { %v1125_v22 = vadd.f32 %v1124_v20, %v1123_v21 }
 0x2f9   : > { %v1126_v23 = vrot.slane %v1125_v22, 4 }
 0x2fb   : > { %v1127_v24 = vadd.f32 %v1126_v23, %v1125_v22 }
 0x2fd   : > { %v1128_v25 = vrot.slane %v1127_v24, 2 }
 0x2ff   : > { %v1129_v26 = vadd.f32 %v1128_v25, %v1127_v24 }
 0x301   : > { %v1130_v27 = vrot.slane %v1129_v26, 1 }
 0x303   : > { %v1131_v31 = vadd.f32 %v1130_v27, %v1129_v26 }
 0x305   : > { %v1133_v36 = vadd.f32 %v1132_v33, %v1131_v31 }
 0x307   : > { %v1260_v41 = vrot.slane %v1133_v36, %v3048_v37 }
 0x35b   : > { %v1356_v29 = vpop.permute.xlu0 %1355 }
 0x35c   : > { %v1354_v30 = vpop.permute.xlu1 %1353  ;;  %v1372_v39 = vsel %vm626_vm1, %v2996_v58, %v1356_v29 }
 0x35d   : > { %v1371_v40 = vsel %vm626_vm1, %v2998_v59, %v1354_v30 }
 0x35f   : > { %v1362_v34 = vpop.permute.xlu0 %1361 }
 0x360   : > { %v1360_v35 = vpop.permute.xlu1 %1359  ;;  %v1374_v42 = vsel %vm1112_vm5, %v1372_v39, %v1362_v34 }
 0x361   : > { %v1373_v45 = vsel %vm1112_vm5, %v1371_v40, %v1360_v35 }
 0x363   : > { %v1368_v43 = vpop.permute.xlu0 %1367 }
 0x364   : > { %v1366_v46 = vpop.permute.xlu1 %1365  ;;  %v1376_v50 = vsel %vm1115_vm6, %v1374_v42, %v1368_v43  ;;  %v1826_v43 = vld [vmem:[#allocation2] sm:$0x1] }
 0x365   : > { %v1375_v52 = vsel %vm1115_vm6, %v1373_v45, %v1366_v46  ;;  %vm1378_vm8 = vcmp.gt.f32.partialorder %v1376_v50, 0.0 }
 0x366   : > { %vm1377_vm9 = vcmp.gt.f32.partialorder %v1375_v52, 0.0 }
 0x3a3   : > { %v2505_v62 = vpop.f32.mrb[4].mxu1 }
 0x3a4   : > { %v1247_v63 = vpop.f32.mrb[5].mxu1  ;;  %v1253_v1 = vadd.f32 %v2505_v62, %v2388_v61 }
 0x3a5   : > { %v1248_v0 = vadd.f32 %v2388_v61, %v1247_v63 }
 0x3a7   : > { %2508 = vmatprep.mubr.msk.f32.mxu0 %vm1261_vm4, %v1248_v0 }
 0x3a8   : > { %2509 = vmatmul.mubr.msk.f32.vlgmr.msra.gmra.mrb[6].mxu0 %vm1261_vm4, %v1253_v1 }
 0x3a9   : > { %2520 = vmatprep.mubr.msk.f32.mxu0 %vm2738_vm0, %v2739_v9 }
 0x47b   : > { %v2510_v44 = vpop.f32.mrb[6].mxu0 }
 0x47c   : > { %v1344_v47 = vadd.f32 %v2510_v44, %v1260_v41  ;;  %v1338_v48 = vpop.f32.mrb[7].mxu0  ;;  %v2400_v44 = vld [vmem:[%s3201_s10 + $0x8] sm:$0xff] }
 0x47d   : > { %v1339_v49 = vadd.f32 %v1338_v48, %v1260_v41  ;;  %v1500_v41 = vld [vmem:[%s3202_s11] sm:$0xff] }
 0x47e   : > { %v1348_v51 = vmul.f32 0.1, %v1344_v47 }
 0x47f   : > { %v1347_v53 = vmul.f32 0.1, %v1339_v49 }
 0x480   : > { %v1350_v54 = vmax.f32 %v1344_v47, %v1348_v51  ;;  %v2403_v47 = vld [vmem:[%s3201_s10 + $0x10] sm:$0xff] }
 0x481   : > { %v1349_v55 = vmax.f32 %v1339_v49, %v1347_v53  ;;  %v2406_v49 = vld [vmem:[%s3201_s10 + $0x18] sm:$0xff] }
 0x482   : > { %v1380_v56 = vsel %vm1378_vm8, %v1350_v54, -1e+09  ;;  %v1825_v54 = vld [vmem:[%s3203_s12] sm:$0x1] }
 0x483   : > { %v1382_v57 = vsel %vm1122_vm7, %v1380_v56, -inf  ;;  %v1379_v60 = vsel %vm1377_vm9, %v1349_v55, -1e+09  ;;  %v1909_v55 = vld [vmem:[%s3205_s14] sm:$0xff] }
 0x484   : > { %v1381_v61 = vsel %vm1122_vm7, %v1379_v60, -inf }
 0x485   : > { %v1383_v62 = vmax.f32 %v1381_v61, %v1382_v57 }
 0x487   : > { %v1384_v63 = vrot.slane %v1383_v62, 4 }
 0x489   : > { %v1385_v0 = vmax.f32 %v1383_v62, %v1384_v63  ;;  %v2410_v62 = vld [vmem:[#allocation3] ss:$0 sm:$0xff] }
 0x48b   : > { %v1386_v1 = vrot.slane %v1385_v0, 2 }
 0x48d   : > { %v1387_v2 = vmax.f32 %v1385_v0, %v1386_v1 }
 0x48f   : > { %v1388_v3 = vrot.slane %v1387_v2, 1 }
 0x491   : > { %v1389_v4 = vmax.f32 %v1387_v2, %v1388_v3 }
 0x493   : > { %v1390_v6 = vsub.f32 %v1379_v60, %v1389_v4  ;;  %v1391_v7 = vsub.f32 %v1380_v56, %v1389_v4 }
 0x495   : > { %v1392_v8 = vmul.f32 1.442695, %v1390_v6  ;;  %v1394_v10 = vmul.f32 1.442695, %v1391_v7 }
 0x497   : > { %2651 = vpow2.f32 %v1392_v8 }
 0x498   : > { %2653 = vpow2.f32 %v1394_v10 }
 0x4a1   : > { %v2652_v11 = vpop.eup %2651 }
 0x4a2   : > { %v2654_v12 = vpop.eup %2653  ;;  %v1396_v13 = vsel %vm1122_vm7, %v2652_v11, 0.0 }
 0x4a3   : > { %v1397_v14 = vsel %vm1122_vm7, %v2654_v12, 0.0 }
 0x4a4   : > { %v1398_v15 = vadd.f32 %v1397_v14, %v1396_v13 }
 0x4a6   : > { %v1399_v16 = vrot.slane %v1398_v15, 4 }
 0x4a8   : > { %v1400_v17 = vadd.f32 %v1399_v16, %v1398_v15 }
 0x4aa   : > { %v1401_v18 = vrot.slane %v1400_v17, 2 }
 0x4ac   : > { %v1402_v19 = vadd.f32 %v1401_v18, %v1400_v17 }
 0x4ae   : > { %v1403_v20 = vrot.slane %v1402_v19, 1 }
 0x4b0   : > { %v1404_v21 = vadd.f32 %v1403_v20, %v1402_v19 }
 0x4b2   : > { %2655 = vrcp.f32 %v1404_v21 }
 0x4bc   : > { %v2656_v22 = vpop.eup %2655 }
 0x4bd   : > { %v1406_v23 = vmul.f32 %v2656_v22, %v2652_v11  ;;  %v1407_v24 = vmul.f32 %v2656_v22, %v2654_v12 }
 0x4bf   : > { %v2575_v25 = vpack.c.bf16 %v1407_v24, %v1406_v23 }
 0x4c1   : > { %2576 = vmatprep.subr.bf16.mxu1 %v2575_v25 }
 0x4c2   : > { %2578 = vmatpush3.bf16.msra.mxu1 %v2575_v25 }
 0x4c3   : > { %2538 = vmatprep.subr.mxu1 %v2739_v9 }
 0x4c5   : > { %2516 = vmatmul.mubr.msk.f32.vlgmr.msra.gmra.mrb[6].mxu1 %vm626_vm1, %v2963_v38  ;;  %v1499_v38 = vld [vmem:[%s3201_s10] sm:$0xff] }
 0x4c6   : > { %2540 = vmatprep.mubr.msk.f32.mxu1 %vm2738_vm0, %v2739_v9 }
 0x598   : > { %v2517_v26 = vpop.f32.mrb[6].mxu1 }
 0x599   : > { %v1490_v27 = vmin.f32 %v2517_v26, 0.0  ;;  %v1478_v28 = vpop.f32.mrb[7].mxu1  ;;  %vm1488_vm10 = vcmp.gt.f32.partialorder %v2517_v26, 0.0 }
 0x59a   : > { %v1489_v29 = vmin.f32 %v1478_v28, 0.0  ;;  %vm1487_vm11 = vcmp.gt.f32.partialorder %v1478_v28, 0.0 }
 0x59b   : > { %v1493_v30 = vmul.f32 1.442695, %v1490_v27 }
 0x59c   : > { %v1491_v31 = vmul.f32 1.442695, %v1489_v29 }
 0x59d   : > { %2657 = vpow2.f32 %v1493_v30 }
 0x59e   : > { %2659 = vpow2.f32 %v1491_v31 }
 0x5a7   : > { %v2658_v32 = vpop.eup %2657 }
 0x5a8   : > { %v2660_v33 = vpop.eup %2659  ;;  %v2397_v34 = vadd.f32 -1.0, %v2658_v32 }
 0x5a9   : > { %v2396_v35 = vadd.f32 -1.0, %v2660_v33 }
 0x5aa   : > { %v1498_v36 = vsel %vm1488_vm10, %v2517_v26, %v2397_v34 }
 0x5ab   : > { %v1497_v39 = vsel %vm1487_vm11, %v1478_v28, %v2396_v35  ;;  %1666 = vrot.lane.b32.xlu0 %v1498_v36, %s3235_s21  ;;  %v1746_v42 = vrot.slane %v1498_v36, 4 }
 0x5ac   : > { %2519 = vmatpush3.msk.msra.mxu0 %vm1268_vm3, %v1497_v39  ;;  %v1584_v40 = vrot.slane %v1497_v39, 4 }
 0x5ad   : > { %2521 = vmatmul.mubr.msk.f32.vlgmr.msra.gmra.mrb[8].mxu0 %vm1261_vm4, %v1499_v38  ;;  %2523 = vmatprep.subr.mxu0 %v2739_v9 }
 0x5ae   : > { %1585 = vrot.lane.b32.xlu1 %v1584_v40, %s3236_s0  ;;  %2525 = vmatprep.mubr.msk.f32.mxu0 %vm2738_vm0, %v2739_v9  ;;  %s598_s0 = sand.u32 1, %s2727_s22  }
 0x5af   : > { %1503 = vperm.xlu0 %2641, %v1500_v41   ;;  %s2262_s20 = scalar_lea.sflag [#allocation5], %s598_s0 }
 0x5b2   : > { %1747 = vrot.lane.b32.xlu1 %v1746_v42, %s2746_s25  ;;  %s2371_s25 = sshll.u32 %s598_s0, 3 }
 0x5b3   : > { %1829 = vperm.xlu0 %2641, %v1826_v43   ;;  %s600_s21 = scalar_lea.vmem [#allocation4], %s2371_s25  ;;  %s2677_s25 = sshll.u32 %s2747_s13, 4  ;;  %s2678_s25 = int_to_ptr.vmem [resolvable:$false] %s2677_s25 }
 0x5b4   : > { %s2280_s26 = sshll.u32 %s600_s21, 4  ;;  %s2679_s6 = scalar_lea.vmem %s2678_s25, 256  ;;  %s3150_s26 = int_to_ptr.vmem [resolvable:$true] %s2280_s26 }
 0x5b5   : > { %s2673_s3 = scalar_lea.vmem %s3150_s26, 128  ;;  %p2680_p0 = scmp.lt.s32.totalorder %s3150_s26, %s2678_s25 }
 0x5b6   : > { %p2674_p11 = scmp.ne.s32.totalorder %s3150_s26, %s2673_s3  ;;  %p2681_p1 = scmp.lt.s32.totalorder %s2679_s6, %s2673_s3 }
 0x5b8   : > { %p2675_p12 = pnand %p2674_p11, %p2892_p5  ;;  %p2682_p2 = por %p2681_p1, %p2680_p0 }
 0x5ba   : > { %p2676_p13 = pneg %p2675_p12 }
 0x5bc   : > { %p2683_p3 = pnand %p2682_p2, %p2676_p13 }
 0x61d   : > { %v1667_v46 = vpop.permute.xlu0 %1666 }
 0x620   : > { %v1586_v45 = vpop.permute.xlu1 %1585 }
 0x621   : > { %2524 = vmatpush3.msk.msra.mxu0 %vm1268_vm3, %v1586_v45  ;;  %v2178_v45 = vld [vmem:[%s3206_s16] sm:$0xff] }
 0x622   : > { %2526 = vmatmul.mubr.msk.f32.vlgmr.msra.gmra.mrb[8].mxu0 %vm1261_vm4, %v2400_v44  ;;  %2528 = vmatprep.subr.mxu0 %v2739_v9 }
 0x623   : > { %2529 = vmatpush3.msk.msra.mxu0 %vm1268_vm3, %v1667_v46  ;;  %2530 = vmatprep.mubr.msk.f32.mxu0 %vm2738_vm0, %v2739_v9  ;;  %v2179_v46 = vld [vmem:[%s3206_s16 + $0x8] sm:$0xff] }
 0x624   : > { %2533 = vmatprep.subr.mxu0 %v2739_v9  ;;  %v1748_v48 = vpop.permute.xlu1 %1747 }
 0x62a   : > { %2531 = vmatmul.mubr.msk.f32.vlgmr.msra.gmra.mrb[8].mxu0 %vm1261_vm4, %v2403_v47  ;;  %v2583_v47 = vpack.c.bf16 %v2179_v46, %v2178_v45 }
 0x62b   : > { %2534 = vmatpush3.msk.msra.mxu0 %vm1268_vm3, %v1748_v48  ;;  %2535 = vmatprep.mubr.msk.f32.mxu0 %vm2738_vm0, %v2739_v9 }
 0x62e   : > { %v1504_v50 = vpop.permute.xlu0 %1503 }
 0x632   : > { %2536 = vmatmul.mubr.msk.f32.vlgmr.msra.gmra.mrb[8].mxu0 %vm1261_vm4, %v2406_v49  ;;  %v1830_v3 = vpop.permute.xlu0 %1829 }
 0x633   : > { %v1835_v4 = vrot.slane %v1830_v3, %v3048_v37 }
 0x705   : > { %v1820_v51 = vpop.f32.mrb[8].mxu0 }
 0x706   : > { %v3102_v52 = vadd.f32 %v1820_v51, %v1504_v50  ;;  %v2537_v53 = vpop.f32.mrb[9].mxu0 }
 0x708   : > { %1917 = vxpose.xlu1.b32.start.end [1/1] (short) (narrow) %v3102_v52, 16  ;;  %2539 = vmatpush3.msra.mxu1 %v3102_v52 }
 0x709   : > { %2541 = vmatmul.mubr.msk.f32.vlgmr.msra.gmra.mrb[8].mxu1 %vm894_vm2, %v1825_v54  ;;  %2543 = vmatprep.subr.mxu1 %v1909_v55 }
 0x70a   : > { %2544 = vmatpush3.msra.mxu1 %v1909_v55 }
 0x70b   : > { %2579 = vmatprep.subr.bf16.mxu1 %v2737_v5 }
 0x788   : > { %v1933_v56 = vpop.trf.xlu1 }
 0x789   : > { %2545 = vmatprep.mubr.msk.f32.mxu1 %vm894_vm2, %v1933_v56 }
 0x78c   : > { %v1934_v57 = vpop.trf.xlu1 }
 0x78d   : > { %2546 = vmatmul.mubr.msk.f32.vlgmr.msra.gmra.mrb[10].mxu1 %vm894_vm2, %v1934_v57 }
 0x78e   : > { %2552 = vmatprep.mubr.msk.f32.mxu1 %vm2738_vm0, %v2739_v9 }
 0x7dc   : > { %v1905_v60 = vpop.f32.mrb[8].mxu1 }
 0x7dd   : > { %v2542_v61 = vpop.f32.mrb[9].mxu1  ;;  %v1906_v6 = vadd.f32 %v1905_v60, %v1835_v4 }
 0x7df   : > { %v2043_v7 = vrot.slane %v1906_v6, %v3048_v37 }
 0x860   : > { %v2547_v63 = vpop.f32.mrb[10].mxu1 }
 0x861   : > { %v2021_v0 = vpop.f32.mrb[11].mxu1  ;;  %v2027_v2 = vadd.f32 %v2547_v63, %v2410_v62 }
 0x862   : > { %v2022_v1 = vadd.f32 %v2410_v62, %v2021_v0 }
 0x864   : > { %2032 = vperm.xlu0 %2641, %v2022_v1  }
 0x868   : > { %2037 = vperm.xlu0 %2641, %v2027_v2  }
 0x8e3   : > { %v2033_v8 = vpop.permute.xlu0 %2032 }
 0x8e4   : > { %v2044_v10 = vadd.f32 %v2043_v7, %v2033_v8 }
 0x8e6   : > { %v2046_v11 = vmul.f32 0.1, %v2044_v10 }
 0x8e7   : > { %v2038_v12 = vpop.permute.xlu0 %2037 }
 0x8e8   : > { %v2048_v13 = vmax.f32 %v2044_v10, %v2046_v11  ;;  %v2045_v14 = vadd.f32 %v2043_v7, %v2038_v12 }
 0x8ea   : > { %v2047_v15 = vmul.f32 0.1, %v2045_v14  ;;  %v2050_v16 = vsel %vm990_vm12, %v2048_v13, -1e+09  ;;  %v2415_v13 = vld [vmem:[%s3207_s17] ss:$0 sm:$0xff] }
 0x8eb   : > { %v2052_v19 = vsel %vm626_vm1, %v2050_v16, -inf }
 0x8ec   : > { %v2049_v17 = vmax.f32 %v2045_v14, %v2047_v15 }
 0x8ee   : > { %v2051_v18 = vsel %vm991_vm13, %v2049_v17, -1e+09 }
 0x8ef   : > { %v2053_v20 = vsel %vm626_vm1, %v2051_v18, -inf }
 0x8f0   : > { %v2054_v21 = vmax.f32 %v2052_v19, %v2053_v20 }
 0x8f2   : > { %v2055_v37 = vrot.slane %v2054_v21, 4 }
 0x8f4   : > { %v2056_v22 = vmax.f32 %v2054_v21, %v2055_v37 }
 0x8f6   : > { %v2057_v23 = vrot.slane %v2056_v22, 2 }
 0x8f8   : > { %v2058_v24 = vmax.f32 %v2056_v22, %v2057_v23 }
 0x8fa   : > { %v2059_v25 = vrot.slane %v2058_v24, 1 }
 0x8fc   : > { %v2060_v26 = vmax.f32 %v2058_v24, %v2059_v25 }
 0x8fe   : > { %v2061_v27 = vsub.f32 %v2050_v16, %v2060_v26  ;;  %v2062_v28 = vsub.f32 %v2051_v18, %v2060_v26 }
 0x900   : > { %v2063_v29 = vmul.f32 1.442695, %v2061_v27  ;;  %v2065_v59 = vmul.f32 1.442695, %v2062_v28 }
 0x902   : > { %2661 = vpow2.f32 %v2063_v29 }
 0x903   : > { %2663 = vpow2.f32 %v2065_v59 }
 0x90c   : > { %v2662_v30 = vpop.eup %2661 }
 0x90d   : > { %v2664_v58 = vpop.eup %2663  ;;  %v2067_v31 = vsel %vm626_vm1, %v2662_v30, 0.0 }
 0x90e   : > { %v2068_v32 = vsel %vm626_vm1, %v2664_v58, 0.0 }
 0x90f   : > { %v2069_v33 = vadd.f32 %v2068_v32, %v2067_v31 }
 0x911   : > { %v2070_v34 = vrot.slane %v2069_v33, 4 }
 0x913   : > { %v2071_v35 = vadd.f32 %v2070_v34, %v2069_v33 }
 0x915   : > { %v2072_v36 = vrot.slane %v2071_v35, 2 }
 0x917   : > { %v2073_v38 = vadd.f32 %v2072_v36, %v2071_v35 }
 0x919   : > { %v2074_v39 = vrot.slane %v2073_v38, 1 }
 0x91b   : > { %v2075_v40 = vadd.f32 %v2074_v39, %v2073_v38 }
 0x91d   : > { %2665 = vrcp.f32 %v2075_v40 }
 0x927   : > { %v2666_v41 = vpop.eup %2665 }
 0x928   : > { %v2077_v42 = vmul.f32 %v2666_v41, %v2662_v30  ;;  %v2078_v43 = vmul.f32 %v2666_v41, %v2664_v58 }
 0x92a   : > { %v2580_v44 = vpack.c.bf16 %v2078_v43, %v2077_v42 }
 0x92c   : > { %2581 = vmatpush3.bf16.msra.mxu1 %v2580_v44 }
 0x92d   : > { %2582 = vmatprep.subr.bf16.mxu1 %v2737_v5 }
 0x92f   : > { %2553 = vmatmul.mubr.msk.f32.vlgmr.msra.gmra.mrb[12].mxu1 %vm626_vm1, %v3102_v52 }
 0x930   : > { %2559 = vmatprep.mubr.msk.f32.mxu1 %vm2738_vm0, %v2739_v9  ;;  %2584 = vmatpush3.bf16.msra.mxu1 %v2583_v47 }
 0xa02   : > { %v2148_v48 = vpop.f32.mrb[12].mxu1 }
 0xa03   : > { %v2153_v49 = vmin.f32 %v2148_v48, 0.0  ;;  %v2554_v50 = vpop.f32.mrb[13].mxu1  ;;  %vm2152_vm14 = vcmp.gt.f32.partialorder %v2148_v48, 0.0 }
 0xa05   : > { %v2154_v5 = vmul.f32 1.442695, %v2153_v49 }
 0xa07   : > { %2667 = vpow2.f32 %v2154_v5 }
 0xa11   : > { %v2668_v51 = vpop.eup %2667 }
 0xa12   : > { %v2414_v52 = vadd.f32 -1.0, %v2668_v51 }
 0xa14   : > { %v2157_v53 = vsel %vm2152_vm14, %v2148_v48, %v2414_v52 }
 0xa15   : > { %v2158_v9 = vsel %vm626_vm1, %v2157_v53, -inf }
 0xa16   : > { %v2159_v54 = vrot.slane %v2158_v9, 4 }
 0xa18   : > { %v2160_v55 = vmax.f32 %v2158_v9, %v2159_v54 }
 0xa1a   : > { %v2161_v56 = vrot.slane %v2160_v55, 2 }
 0xa1c   : > { %v2162_v57 = vmax.f32 %v2160_v55, %v2161_v56 }
 0xa1e   : > { %v2163_v60 = vrot.slane %v2162_v57, 1 }
 0xa20   : > { %v2164_v61 = vmax.f32 %v2162_v57, %v2163_v60 }
 0xa22   : > { %v2165_v62 = vsub.f32 %v2157_v53, %v2164_v61 }
 0xa24   : > { %v2166_v63 = vmul.f32 1.442695, %v2165_v62 }
 0xa26   : > { %2669 = vpow2.f32 %v2166_v63 }
 0xa30   : > { %v2670_v0 = vpop.eup %2669 }
 0xa31   : > { %v2168_v1 = vsel %vm626_vm1, %v2670_v0, 0.0 }
 0xa32   : > { %v2169_v2 = vrot.slane %v2168_v1, 4 }
 0xa34   : > { %v2170_v3 = vadd.f32 %v2169_v2, %v2168_v1 }
 0xa36   : > { %v2171_v4 = vrot.slane %v2170_v3, 2 }
 0xa38   : > { %v2172_v6 = vadd.f32 %v2171_v4, %v2170_v3 }
 0xa3a   : > { %v2173_v7 = vrot.slane %v2172_v6, 1 }
 0xa3c   : > { %v2174_v8 = vadd.f32 %v2173_v7, %v2172_v6 }
 0xa3e   : > { %2671 = vlog2.f32 %v2174_v8 }
 0xa48   : > { %v2672_v10 = vpop.eup %2671 }
 0xa49   : > { %v2176_v11 = vmul.f32 0.6931472, %v2672_v10 }
 0xa4b   : > { %v2177_v12 = vsub.f32 %v2165_v62, %v2176_v11 }
 0xa4d   : > { %2560 = vmatmul.mubr.msk.f32.vlgmr.msra.gmra.mrb[14].mxu1 %vm626_vm1, %v2177_v12 }
 0xb20   : > { %v2256_v14 = vpop.f32.mrb[14].mxu1 }
 0xb21   : > { %v2257_v15 = vadd.f32 %v2415_v13, %v2256_v14  ;;  %v2561_v16 = vpop.f32.mrb[15].mxu1 }
 0xb23   : > { %2260 = vst.msk [vmem:[%s600_s21] sm:$0xff] %vm626_vm1, %v2257_v15 }
 0xb24   : > { %2686 = shalt.err (!%p2683_p3)
}
 0xb25   : > { %s2687_s4 = scalar_lea.hbm %s3148_s5, 128  ;;  %s2691_s21 = scalar_lea.hbm %s3208_s18, 256 }
 0xb26   : > { %p2688_p4 = scmp.ne.s32.totalorder %s3148_s5, %s2687_s4  ;;  %p2692_p9 = scmp.lt.u32.totalorder %s3148_s5, %s3208_s18 }
 0xb27   : > { %p2693_p10 = scmp.lt.u32.totalorder %s2691_s21, %s2687_s4  ;;  %p2695_p12 = scmp.lt.u32.totalorder %s2687_s4, %s3148_s5 }
 0xb28   : > { %p2689_p7 = pnand %p2688_p4, %p2892_p5 }
 0xb29   : > { %p2694_p11 = por %p2693_p10, %p2692_p9 }
 0xb2a   : > { %p2690_p8 = pneg %p2689_p7 }
 0xb2b   : > { %p2696_p13 = por %p2695_p12, %p2694_p11 }
 0xb2d   : > { %p2697_p0 = pnand %p2696_p13, %p2690_p8 }
 0xb2f   : > { %2700 = shalt.err (!%p2697_p0)
}
 0xb30   : > { %2592 = dma.vmem_to_hbm [thread:$0]  (%p2892_p5), %s3150_s26, 128, %s3148_s5, %s2262_s20  }
 0xb31 PF: > { %p2598_p1 = scmp.ge.s32.totalorder %s2735_s23, 2  ;;  %s2295_s6 = sand.u32 1, %s2723_s1  }
 0xb32   : > { %s2296_s3 = scalar_lea.sflag [#allocation5], %s2295_s6 }
 0xb33   : > { %p2595_p2 = pnand %p2598_p1, %p2896_p6 }
 0xb35   : > { %2718 = dma.done.wait (!%p2595_p2), %s2296_s3, 128  }
 0xb36   : > { %2720 = vsyncadd (!%p2595_p2), %s2296_s3, 4294967168  ;;  %s3237_s25 = sld [smem:[#allocation7_spill]]  ;;  %p34_p3 = scmp.ge.s32.totalorder %s2879_s24, 4  }
 0xb37   : > { %s3238_s1 = smov %s2727_s22  ;;  %s3239_s22 = smov %s2731_s2 }
 0xb38   : > { %s3241_s23 = smov %s2879_s24  ;;  %36 = sbr.rel (!%p34_p3) target bundleno = 11 (0xb), region = 144 }
 0xb3c   : > { %s3240_s2 = smov %s3237_s25 }
 0xb3f   :  { %2309 = vsyncpa [#allocation5], 1 }
 0xb40   :  { %2311 = vsyncpa [#allocation5 + $0x1], 1 }

</bundles_post_ra>
